<compile_context>
chip_gen: v7x
topology: tpu7x:2x2x1
jax: 0.10.0
libtpu: 0.0.40
codegen_flags: <defaults>
</compile_context>

<pallas_src>
import functools
import math

import jax
import jax.numpy as jnp
from jax.experimental import pallas as pl
from jax.experimental.pallas import tpu as pltpu


BN_EPS = 1e-5  # nn.BatchNorm2d default eps


def autopad(kernel, padding=None):
    if padding is None:
        padding = kernel // 2 if isinstance(kernel, int) else [v // 2 for v in kernel]
    return padding


# ----------------------------------------------------------------------------
# Pallas kernel: im2col-in-VMEM + single MXU contraction + folded-BN epilogue,
# storing a lane-dense NCHW (Cout, th*wo) tile.
# ----------------------------------------------------------------------------
def _focus_conv_kernel(x_ref, w_ref, b_ref, o_ref, slab_ref, *, k, th, wo, c4, act):
    """One (batch, output-row-tile) grid cell.

    x_ref   : (Hp, Wp, 4C)        bf16  padded s2d image (VMEM-resident per batch)
    w_ref   : (k*k*4C, Cout)      bf16  BN scale folded into the weights
    b_ref   : (1, Cout)           f32   folded BN bias
    o_ref   : (Cout, th*wo)       bf16  NCHW output tile, lane-dense minor dim
    slab_ref: (th*wo, k*k*4C)     bf16  VMEM im2col scratch
    """
    r = pl.program_id(1)
    row0 = r * th
    if th % 8 == 0:
        row0 = pl.multiple_of(row0, 8)  # aligned sublane starts for the row loads

    # Build the im2col slab: one sliced copy per tap row, k static sub-slices
    # each -> a single MXU contraction with K = k*k*4C (>=128 for k=3).
    for ky in range(k):
        rows = x_ref[pl.ds(row0 + ky, th), :, :]                 # (th, Wp, 4C)
        for kx in range(k):
            t = ky * k + kx
            slab_ref[:, t * c4:(t + 1) * c4] = (
                rows[:, kx:kx + wo, :].reshape(th * wo, c4))

    y = jnp.dot(slab_ref[...], w_ref[...],
                preferred_element_type=jnp.float32)              # (th*wo, Cout) f32
    y = y + b_ref[...]                                           # folded BN bias
    if act:
        y = jnp.where(y > 0, y, 0.1 * y)                         # LeakyReLU(0.1)

    # Transpose once in-kernel so the HBM store is NCHW and lane-dense.
    o_ref[...] = jnp.transpose(y).astype(o_ref.dtype)            # (Cout, th*wo)


def _pick_row_tile(ho, wo, cout, ktot, budget_bytes):
    """Pick the output-row tile `th`.

    Constraints / preferences:
      * th divides ho (no dropped rows),
      * legality of the fused (th*wo) minor out-block dim: th == ho or
        (th*wo) % 128 == 0,
      * bf16 output tile + im2col slab fit `budget_bytes`,
      * prefer th % 8 == 0 (aligned sublane starts).
    """
    divs = [d for d in range(1, ho + 1) if ho % d == 0]

    def legal(d):
        return d == ho or (d * wo) % 128 == 0

    def fits(d):
        return d * wo * (cout + ktot) * 2 <= budget_bytes

    cands = [d for d in divs if legal(d) and fits(d) and d % 8 == 0]
    if not cands:
        cands = [d for d in divs if legal(d) and fits(d)]
    if cands:
        return max(cands)
    cands = [d for d in divs if legal(d)]
    return min(cands) if cands else ho


def focus_conv(xs2d_padded, w2, bias2, *, k, act, out_dtype=jnp.bfloat16,
               row_budget_bytes=4 << 20):
    """Conv(k, stride=1) + folded BN + LeakyReLU over a padded s2d bf16 image.

    xs2d_padded: (N, Hp, Wp, 4C) bf16
    w2         : (k*k*4C, Cout)  bf16   (BN scale already folded in)
    bias2      : (1, Cout)       f32    (folded BN bias)
    returns    : (N, Cout, Ho, Wo) out_dtype  (NCHW, no wrapper transpose)
    """
    n, hp, wp, c4 = xs2d_padded.shape
    cout = w2.shape[-1]
    ho, wo = hp - k + 1, wp - k + 1
    ktot = k * k * c4
    assert ho >= 1 and wo >= 1

    th = _pick_row_tile(ho, wo, cout, ktot, row_budget_bytes)
    grid = (n, ho // th)

    kernel = functools.partial(_focus_conv_kernel,
                               k=k, th=th, wo=wo, c4=c4, act=bool(act))
    out = pl.pallas_call(
        kernel,
        out_shape=jax.ShapeDtypeStruct((n, cout, ho * wo), out_dtype),
        grid=grid,
        in_specs=[
            # Full padded image of batch element `ni` (batch dim squeezed).
            # Constant block index across the row-tile axis -> stays resident
            # in VMEM instead of being re-DMA'd per tile.
            pl.BlockSpec((None, hp, wp, c4), lambda ni, ri: (ni, 0, 0, 0)),
            # Grid-invariant folded weight / bias (tiny; fetched once).
            pl.BlockSpec((ktot, cout), lambda ni, ri: (0, 0)),
            pl.BlockSpec((1, cout), lambda ni, ri: (0, 0)),
        ],
        # NCHW output with fused (Ho*Wo) minor dim -> lane-dense stores.
        out_specs=pl.BlockSpec((None, cout, th * wo), lambda ni, ri: (ni, 0, ri)),
        scratch_shapes=[pltpu.VMEM((th * wo, ktot), jnp.bfloat16)],
        compiler_params=pltpu.CompilerParams(
            dimension_semantics=("parallel", "parallel"),
            # Explicit and identical on every generation; conservative enough
            # for v7x's 64 MiB physical VMEM, raise on v5e/v6e if desired.
            vmem_limit_bytes=48 * 1024 * 1024,
        ),
    )(xs2d_padded, w2, bias2)

    return out.reshape(n, cout, ho, wo)


# ----------------------------------------------------------------------------
# Focus module (JAX/Pallas equivalent of the PyTorch module)
# ----------------------------------------------------------------------------
class FocusPallas:
    # TODO(synk): training-mode BatchNorm (batch statistics) not implemented;
    # eval-mode running-stats BN is folded into the conv weight/bias.

    def __init__(self, in_channel, out_channel, kernel_size=1, stride=1,
                 padding=None, groups=1, activation=True, *, key,
                 out_dtype=jnp.bfloat16):
        assert groups == 1, "TODO(synk): grouped conv not implemented (Focus uses groups=1)"
        self.k = kernel_size
        self.s = stride
        self.p = padding
        self.act = bool(activation)
        self.out_dtype = out_dtype  # pass jnp.float32 to exactly match torch's dtype
        cin4 = in_channel * 4
        std = math.sqrt(2.0 / (kernel_size * kernel_size * cin4))
        # HWIO, in-channel order = [row-even/col-even, row-odd/col-even,
        #                           row-even/col-odd, row-odd/col-odd] * C
        self.w = jax.random.normal(
            key, (kernel_size, kernel_size, cin4, out_channel), jnp.float32) * std
        # BatchNorm2d defaults: gamma=1, beta=0, running_mean=0, running_var=1.
        self.gamma = jnp.ones((out_channel,), jnp.float32)
        self.beta = jnp.zeros((out_channel,), jnp.float32)
        self.mean = jnp.zeros((out_channel,), jnp.float32)
        self.var = jnp.ones((out_channel,), jnp.float32)

    @staticmethod
    def _space_to_depth(x_nhwc):
        # PyTorch: cat([x[..., ::2, ::2], x[..., 1::2, ::2],
        #               x[..., ::2, 1::2], x[..., 1::2, 1::2]], dim=1)  (NCHW)
        return jnp.concatenate(
            [x_nhwc[:, ::2, ::2, :], x_nhwc[:, 1::2, ::2, :],
             x_nhwc[:, ::2, 1::2, :], x_nhwc[:, 1::2, 1::2, :]], axis=-1)

    def __call__(self, x_nchw):
        if self.s != 1:
            # TODO(synk): stride > 1 direct-conv path not implemented (Focus uses stride=1).
            raise NotImplementedError("stride > 1 not implemented")
        k = self.k
        p = autopad(k, self.p)
        n, c, h, w = x_nchw.shape
        c4 = 4 * c

        # bf16 BEFORE any layout work: transpose + s2d + pad all move 2 B/elem.
        xb = x_nchw.astype(jnp.bfloat16)
        xh = jnp.transpose(xb, (0, 2, 3, 1))                       # NHWC bf16
        xs = self._space_to_depth(xh)                              # (N, H/2, W/2, 4C)
        if p:
            xs = jnp.pad(xs, ((0, 0), (p, p), (p, p), (0, 0)))     # zero pad, bf16-exact

        # Fold eval-mode BN into the conv: scale goes into W, only bias remains.
        scale = (self.gamma / jnp.sqrt(self.var + BN_EPS)).astype(jnp.float32)
        bias = (self.beta - self.mean * scale).astype(jnp.float32).reshape(1, -1)
        w2 = (self.w * scale.reshape(1, 1, 1, -1)).reshape(k * k * c4, -1)
        w2 = w2.astype(jnp.bfloat16)

        # Kernel writes NCHW directly with a fused Ho*Wo minor dim; this
        # reshape is free (same memory layout).
        return focus_conv(xs, w2, bias, k=k, act=self.act, out_dtype=self.out_dtype)


# ----------------------------------------------------------------------------
# Pure-JAX reference (same bf16-rounded operands, f32 conv at HIGHEST precision)
# ----------------------------------------------------------------------------
def focus_reference(x_nchw, module):
    k = module.k
    p = autopad(k, module.p)
    x = jnp.transpose(x_nchw.astype(jnp.float32), (0, 2, 3, 1))
    x = FocusPallas._space_to_depth(x)
    scale = module.gamma / jnp.sqrt(module.var + BN_EPS)
    bias = module.beta - module.mean * scale
    a = x.astype(jnp.bfloat16).astype(jnp.float32)
    wf = (module.w * scale.reshape(1, 1, 1, -1)).astype(jnp.bfloat16).astype(jnp.float32)
    y = jax.lax.conv_general_dilated(
        a, wf, (module.s, module.s), [(p, p), (p, p)],
        dimension_numbers=("NHWC", "HWIO", "NHWC"),
        precision=jax.lax.Precision.HIGHEST)
    y = y + bias.reshape(1, 1, 1, -1)
    if module.act:
        y = jnp.where(y > 0, y, 0.1 * y)
    return jnp.transpose(y, (0, 3, 1, 2))    # NCHW f32


# ----------------------------------------------------------------------------
if __name__ == "__main__":
    key = jax.random.PRNGKey(0)
    kx, kw1, kw2, kg, kb, km, kv = jax.random.split(key, 7)

    n, c, h, w = 2, 4, 16, 16
    x = jax.random.normal(kx, (n, c, h, w), jnp.float32)          # NCHW input

    # YOLOv5-style usage: Focus(c, 32, kernel_size=3) — exercises the 3x3 tap
    # loop and (with non-trivial stats) the BN folding.
    focus3 = FocusPallas(c, 32, kernel_size=3, key=kw1)
    focus3.gamma = 1.0 + 0.2 * jax.random.normal(kg, (32,), jnp.float32)
    focus3.beta = 0.1 * jax.random.normal(kb, (32,), jnp.float32)
    focus3.mean = 0.1 * jax.random.normal(km, (32,), jnp.float32)
    focus3.var = 0.5 + jax.random.uniform(kv, (32,), jnp.float32)  # in [0.5, 1.5]

    out3 = jax.block_until_ready(focus3(x))
    assert out3.shape == (n, 32, h // 2, w // 2), out3.shape
    assert out3.dtype == jnp.bfloat16, out3.dtype
    assert bool(jnp.all(jnp.isfinite(out3.astype(jnp.float32))))
    ref3 = focus_reference(x, focus3)
    ok3 = bool(jnp.allclose(out3.astype(jnp.float32), ref3, rtol=3e-2, atol=1e-1))
    assert ok3, ("k=3 mismatch vs reference, max err = "
                 f"{float(jnp.max(jnp.abs(out3.astype(jnp.float32) - ref3)))}")

    # Module defaults: Focus(c, 16) with kernel_size=1, stride=1 (identity BN).
    focus1 = FocusPallas(c, 16, key=kw2)
    out1 = jax.block_until_ready(focus1(x))
    assert out1.shape == (n, 16, h // 2, w // 2), out1.shape
    ref1 = focus_reference(x, focus1)
    ok1 = bool(jnp.allclose(out1.astype(jnp.float32), ref1, rtol=3e-2, atol=1e-1))
    assert ok1, ("k=1 mismatch vs reference, max err = "
                 f"{float(jnp.max(jnp.abs(out1.astype(jnp.float32) - ref1)))}")

    print("KERNEL_OK")
</pallas_src>

<mosaic_0001>
module attributes {stable_mosaic.version = 11 : i64} {
  func.func @_focus_conv_kernel(%arg0: i32, %arg1: i32, %arg2: memref<1x10x10x16xbf16, #tpu.memory_space<vmem>>, %arg3: memref<144x32xbf16, #tpu.memory_space<vmem>>, %arg4: memref<1x32xf32, #tpu.memory_space<vmem>>, %arg5: memref<1x32x64xbf16, #tpu.memory_space<vmem>>, %arg6: memref<64x144xbf16, #tpu.memory_space<vmem>>) attributes {dimension_semantics = [#tpu.dimension_semantics<parallel>, #tpu.dimension_semantics<parallel>], iteration_bounds = array<i64: 2, 1>, scalar_prefetch = 0 : i64, scratch_operands = 1 : i64, tpu.core_type = #tpu.core_type<tc>, window_params = [{transform_indices = @transform_0, window_bounds = array<i64: 1, 10, 10, 16>}, {pipeline_mode = #tpu.pipeline_mode<synchronous>, transform_indices = @transform_1, window_bounds = array<i64: 144, 32>}, {pipeline_mode = #tpu.pipeline_mode<synchronous>, transform_indices = @transform_2, window_bounds = array<i64: 1, 32>}, {transform_indices = @transform_3, window_bounds = array<i64: 1, 32, 64>}]} {
    %c8_i32 = arith.constant 8 : i32
    %0 = arith.muli %arg1, %c8_i32 : i32
    %1 = tpu.assume_multiple %0, 8 : i32
    %c0_i32 = arith.constant 0 : i32
    %2 = arith.addi %1, %c0_i32 : i32
    %c0 = arith.constant 0 : index
    %3 = arith.index_cast %2 : i32 to index
    %c0_0 = arith.constant 0 : index
    %c0_1 = arith.constant 0 : index
    %4 = vector.load %arg2[%c0, %3, %c0_0, %c0_1] : memref<1x10x10x16xbf16, #tpu.memory_space<vmem>>, vector<1x8x10x16xbf16>
    %5 = vector.shape_cast %4 : vector<1x8x10x16xbf16> to vector<8x10x16xbf16>
    %6 = vector.extract_strided_slice %5 {offsets = [0, 0, 0], sizes = [8, 8, 16], strides = [1, 1, 1]} : vector<8x10x16xbf16> to vector<8x8x16xbf16>
    %7 = vector.shape_cast %6 : vector<8x8x16xbf16> to vector<64x16xbf16>
    %c0_2 = arith.constant 0 : index
    %c0_3 = arith.constant 0 : index
    %8 = vector.load %arg6[%c0_2, %c0_3] : memref<64x144xbf16, #tpu.memory_space<vmem>>, vector<64x16xbf16>
    tpu.vector_store %arg6[%c0_2, %c0_3], %7 {strides = array<i32>} : memref<64x144xbf16, #tpu.memory_space<vmem>>, vector<64x16xbf16>,
    %9 = vector.extract_strided_slice %5 {offsets = [0, 1, 0], sizes = [8, 8, 16], strides = [1, 1, 1]} : vector<8x10x16xbf16> to vector<8x8x16xbf16>
    %10 = vector.shape_cast %9 : vector<8x8x16xbf16> to vector<64x16xbf16>
    %c0_4 = arith.constant 0 : index
    %c16 = arith.constant 16 : index
    %11 = vector.load %arg6[%c0_4, %c16] : memref<64x144xbf16, #tpu.memory_space<vmem>>, vector<64x16xbf16>
    tpu.vector_store %arg6[%c0_4, %c16], %10 {strides = array<i32>} : memref<64x144xbf16, #tpu.memory_space<vmem>>, vector<64x16xbf16>,
    %12 = vector.extract_strided_slice %5 {offsets = [0, 2, 0], sizes = [8, 8, 16], strides = [1, 1, 1]} : vector<8x10x16xbf16> to vector<8x8x16xbf16>
    %13 = vector.shape_cast %12 : vector<8x8x16xbf16> to vector<64x16xbf16>
    %c0_5 = arith.constant 0 : index
    %c32 = arith.constant 32 : index
    %14 = vector.load %arg6[%c0_5, %c32] : memref<64x144xbf16, #tpu.memory_space<vmem>>, vector<64x16xbf16>
    tpu.vector_store %arg6[%c0_5, %c32], %13 {strides = array<i32>} : memref<64x144xbf16, #tpu.memory_space<vmem>>, vector<64x16xbf16>,
    %c1_i32 = arith.constant 1 : i32
    %15 = arith.addi %1, %c1_i32 : i32
    %c0_6 = arith.constant 0 : index
    %16 = arith.index_cast %15 : i32 to index
    %c0_7 = arith.constant 0 : index
    %c0_8 = arith.constant 0 : index
    %17 = vector.load %arg2[%c0_6, %16, %c0_7, %c0_8] : memref<1x10x10x16xbf16, #tpu.memory_space<vmem>>, vector<1x8x10x16xbf16>
    %18 = vector.shape_cast %17 : vector<1x8x10x16xbf16> to vector<8x10x16xbf16>
    %19 = vector.extract_strided_slice %18 {offsets = [0, 0, 0], sizes = [8, 8, 16], strides = [1, 1, 1]} : vector<8x10x16xbf16> to vector<8x8x16xbf16>
    %20 = vector.shape_cast %19 : vector<8x8x16xbf16> to vector<64x16xbf16>
    %c0_9 = arith.constant 0 : index
    %c48 = arith.constant 48 : index
    %21 = vector.load %arg6[%c0_9, %c48] : memref<64x144xbf16, #tpu.memory_space<vmem>>, vector<64x16xbf16>
    tpu.vector_store %arg6[%c0_9, %c48], %20 {strides = array<i32>} : memref<64x144xbf16, #tpu.memory_space<vmem>>, vector<64x16xbf16>,
    %22 = vector.extract_strided_slice %18 {offsets = [0, 1, 0], sizes = [8, 8, 16], strides = [1, 1, 1]} : vector<8x10x16xbf16> to vector<8x8x16xbf16>
    %23 = vector.shape_cast %22 : vector<8x8x16xbf16> to vector<64x16xbf16>
    %c0_10 = arith.constant 0 : index
    %c64 = arith.constant 64 : index
    %24 = vector.load %arg6[%c0_10, %c64] : memref<64x144xbf16, #tpu.memory_space<vmem>>, vector<64x16xbf16>
    tpu.vector_store %arg6[%c0_10, %c64], %23 {strides = array<i32>} : memref<64x144xbf16, #tpu.memory_space<vmem>>, vector<64x16xbf16>,
    %25 = vector.extract_strided_slice %18 {offsets = [0, 2, 0], sizes = [8, 8, 16], strides = [1, 1, 1]} : vector<8x10x16xbf16> to vector<8x8x16xbf16>
    %26 = vector.shape_cast %25 : vector<8x8x16xbf16> to vector<64x16xbf16>
    %c0_11 = arith.constant 0 : index
    %c80 = arith.constant 80 : index
    %27 = vector.load %arg6[%c0_11, %c80] : memref<64x144xbf16, #tpu.memory_space<vmem>>, vector<64x16xbf16>
    tpu.vector_store %arg6[%c0_11, %c80], %26 {strides = array<i32>} : memref<64x144xbf16, #tpu.memory_space<vmem>>, vector<64x16xbf16>,
    %c2_i32 = arith.constant 2 : i32
    %28 = arith.addi %1, %c2_i32 : i32
    %c0_12 = arith.constant 0 : index
    %29 = arith.index_cast %28 : i32 to index
    %c0_13 = arith.constant 0 : index
    %c0_14 = arith.constant 0 : index
    %30 = vector.load %arg2[%c0_12, %29, %c0_13, %c0_14] : memref<1x10x10x16xbf16, #tpu.memory_space<vmem>>, vector<1x8x10x16xbf16>
    %31 = vector.shape_cast %30 : vector<1x8x10x16xbf16> to vector<8x10x16xbf16>
    %32 = vector.extract_strided_slice %31 {offsets = [0, 0, 0], sizes = [8, 8, 16], strides = [1, 1, 1]} : vector<8x10x16xbf16> to vector<8x8x16xbf16>
    %33 = vector.shape_cast %32 : vector<8x8x16xbf16> to vector<64x16xbf16>
    %c0_15 = arith.constant 0 : index
    %c96 = arith.constant 96 : index
    %34 = vector.load %arg6[%c0_15, %c96] : memref<64x144xbf16, #tpu.memory_space<vmem>>, vector<64x16xbf16>
    tpu.vector_store %arg6[%c0_15, %c96], %33 {strides = array<i32>} : memref<64x144xbf16, #tpu.memory_space<vmem>>, vector<64x16xbf16>,
    %35 = vector.extract_strided_slice %31 {offsets = [0, 1, 0], sizes = [8, 8, 16], strides = [1, 1, 1]} : vector<8x10x16xbf16> to vector<8x8x16xbf16>
    %36 = vector.shape_cast %35 : vector<8x8x16xbf16> to vector<64x16xbf16>
    %c0_16 = arith.constant 0 : index
    %c112 = arith.constant 112 : index
    %37 = vector.load %arg6[%c0_16, %c112] : memref<64x144xbf16, #tpu.memory_space<vmem>>, vector<64x16xbf16>
    tpu.vector_store %arg6[%c0_16, %c112], %36 {strides = array<i32>} : memref<64x144xbf16, #tpu.memory_space<vmem>>, vector<64x16xbf16>,
    %38 = vector.extract_strided_slice %31 {offsets = [0, 2, 0], sizes = [8, 8, 16], strides = [1, 1, 1]} : vector<8x10x16xbf16> to vector<8x8x16xbf16>
    %39 = vector.shape_cast %38 : vector<8x8x16xbf16> to vector<64x16xbf16>
    %c0_17 = arith.constant 0 : index
    %c128 = arith.constant 128 : index
    %40 = vector.load %arg6[%c0_17, %c128] : memref<64x144xbf16, #tpu.memory_space<vmem>>, vector<64x16xbf16>
    tpu.vector_store %arg6[%c0_17, %c128], %39 {strides = array<i32>} : memref<64x144xbf16, #tpu.memory_space<vmem>>, vector<64x16xbf16>,
    %c0_18 = arith.constant 0 : index
    %c0_19 = arith.constant 0 : index
    %41 = vector.load %arg6[%c0_18, %c0_19] : memref<64x144xbf16, #tpu.memory_space<vmem>>, vector<64x144xbf16>
    %c0_20 = arith.constant 0 : index
    %c0_21 = arith.constant 0 : index
    %42 = vector.load %arg3[%c0_20, %c0_21] : memref<144x32xbf16, #tpu.memory_space<vmem>>, vector<144x32xbf16>
    %cst = arith.constant dense<0.000000e+00> : vector<64x32xf32>
    %43 = tpu.matmul %41, %42, %cst {dimension_numbers = #tpu.dot_dimension_numbers<[1], [0], [0], [1], [0, 0, 1, 1], [], []>} : vector<64x144xbf16>, vector<144x32xbf16>, vector<64x32xf32> -> vector<64x32xf32>
    %c0_22 = arith.constant 0 : index
    %c0_23 = arith.constant 0 : index
    %44 = vector.load %arg4[%c0_22, %c0_23] : memref<1x32xf32, #tpu.memory_space<vmem>>, vector<1x32xf32>
    %45 = vector.broadcast %44 : vector<1x32xf32> to vector<64x32xf32>
    %46 = arith.addf %43, %45 : vector<64x32xf32>
    %cst_24 = arith.constant 0.000000e+00 : f32
    %47 = vector.broadcast %cst_24 : f32 to vector<64x32xf32>
    %48 = arith.cmpf ogt, %46, %47 : vector<64x32xf32>
    %cst_25 = arith.constant 1.000000e-01 : f32
    %49 = vector.broadcast %cst_25 : f32 to vector<64x32xf32>
    %50 = arith.mulf %49, %46 : vector<64x32xf32>
    %51 = arith.select %48, %46, %50 : vector<64x32xi1>, vector<64x32xf32>
    %52 = tpu.transpose %51, [1, 0] : vector<64x32xf32> -> vector<32x64xf32>
    %53 = arith.truncf %52 : vector<32x64xf32> to vector<32x64xbf16>
    %c0_26 = arith.constant 0 : index
    %c0_27 = arith.constant 0 : index
    %c0_28 = arith.constant 0 : index
    %54 = vector.load %arg5[%c0_26, %c0_27, %c0_28] : memref<1x32x64xbf16, #tpu.memory_space<vmem>>, vector<1x32x64xbf16>
    %55 = vector.shape_cast %54 : vector<1x32x64xbf16> to vector<32x64xbf16>
    %56 = vector.shape_cast %53 : vector<32x64xbf16> to vector<1x32x64xbf16>
    tpu.vector_store %arg5[%c0_26, %c0_27, %c0_28], %56 {strides = array<i32>} : memref<1x32x64xbf16, #tpu.memory_space<vmem>>, vector<1x32x64xbf16>,
    return
  }
  func.func @transform_0(%arg0: i32, %arg1: i32) -> (i32, i32, i32, i32) {
    %c0_i32 = arith.constant 0 : i32
    %c0_i32_0 = arith.constant 0 : i32
    %c0_i32_1 = arith.constant 0 : i32
    %c0_i32_2 = arith.constant 0 : i32
    return %arg0, %c0_i32, %c0_i32_0, %c0_i32_1 : i32, i32, i32, i32
  }
  func.func @transform_1(%arg0: i32, %arg1: i32) -> (i32, i32) {
    %c0_i32 = arith.constant 0 : i32
    %c0_i32_0 = arith.constant 0 : i32
    %c0_i32_1 = arith.constant 0 : i32
    return %c0_i32, %c0_i32_0 : i32, i32
  }
  func.func @transform_2(%arg0: i32, %arg1: i32) -> (i32, i32) {
    %c0_i32 = arith.constant 0 : i32
    %c0_i32_0 = arith.constant 0 : i32
    %c0_i32_1 = arith.constant 0 : i32
    return %c0_i32, %c0_i32_0 : i32, i32
  }
  func.func @transform_3(%arg0: i32, %arg1: i32) -> (i32, i32, i32) {
    %c0_i32 = arith.constant 0 : i32
    %c0_i32_0 = arith.constant 0 : i32
    return %arg0, %c0_i32, %arg1 : i32, i32, i32
  }
}

</mosaic_0001>

<bundles_post_ra>
// kernel: tpu_custom_call.1
= control target key start
LH: loop header
LB: loop body
LE: loop exit
PB: predicated region body
PF: predicated region fallthrough
CT: control target
= control target key end

     0   :  { %8 = vsyncpa [#allocation4], 0  ;;  %s2211_s0 = inlined_call_operand.vmem [shape: bf16[2,10,10,16], index: 0, kind: input, shape index: {}]   ;;  %s2212_s1 = inlined_call_operand.vmem [shape: bf16[144,32], index: 1, kind: input, shape index: {}]   ;;  %s2213_s2 = inlined_call_operand.vmem [shape: f32[1,32], index: 2, kind: input, shape index: {}]   ;;  %s2214_s3 = inlined_call_operand.hbm [shape: bf16[2,32,64], index: 3, kind: output, shape index: {}]  }
   0x1   :  { %10 = vsyncpa [#allocation4 + $0x1], 0  ;;  %s1650_s12 = smov 0   ;;  %s1652_s13 = smov 0  }
   0x2   :  { %s1654_s14 = smov 0   ;;  %s1656_s15 = smov 0  }
   0x3   :  { %s1658_s16 = smov 0   ;;  %s1660_s17 = smov 0  }
   0x4 LB: > { %s1312_s18 = sadd.s32 4294967295, %s1618_s17   ;;  %s1313_s19 = sadd.s32 4294967294, %s1618_s17   ;;  %s1618_s17 = sphi %s1660_s17, %s16_s17   ;;  %s1614_s16 = sphi %s1658_s16, %s2225_s16   ;;  %s1610_s15 = sphi %s1656_s15, %s2224_s15   ;;  %s1606_s14 = sphi %s1654_s14, %s2223_s14   ;;  %s1602_s13 = sphi %s1652_s13, %s2222_s13   ;;  %s1598_s12 = sphi %s1650_s12, %s2221_s12  }
   0x5   : > { %s28_s20 = sadd.s32 1, %s1614_s16  ;;  %s105_s21 = sadd.s32 1, %s1606_s14 }
   0x6   : > { %p30_p0 = scmp.ge.s32.totalorder %s28_s20, 2  ;;  %p115_p1 = scmp.ne.s32.totalorder %s1606_s14, %s1602_s13 }
   0x7   : > { %p116_p2 = scmp.eq.s32.totalorder %s1312_s18, 1  ;;  %p121_p3 = scmp.ne.s32.totalorder %s1602_s13, %s1598_s12 }
   0x8   : > { %s2227_s20 = smov (%p30_p0, %s28_s20), 0  ;;  %p122_p5 = scmp.eq.s32.totalorder %s1313_s19, 1 }
   0x9   : > { %p1690_p4 = por %p116_p2, %p115_p1  ;;  %s100_s23 = ssub.s32 %s1614_s16, %s2227_s20 }
   0xa   : > { %p1316_p6 = scmp.ge.s32.totalorder %s1618_s17, 1  ;;  %p103_p7 = scmp.eq.s32.totalorder %s100_s23, 0 }
   0xb   : > { %p1697_p8 = por %p122_p5, %p121_p3  ;;  %p154_p9 = scmp.lt.s32.totalorder %s1618_s17, 3 }
   0xc   : > { %s1703_s25 = scalar_select %p103_p7, %s1606_s14, %s105_s21  }
   0xd   : > { %p155_p10 = pnand %p1316_p6, %p154_p9 }
   0xe   : > { %p178_p11 = scmp.lt.s32.totalorder (!%p155_p10), %s1610_s15, 1  ;;  %v1620_v0 = vmov (!%p155_p10), 0   ;;  %v1531_v1 = vld [vmem:[%s2212_s1] sm:$0xff] (!%p155_p10)   ;;  %vm385_vm0 = vcmask (!%p155_p10), 1042432   ;;  %v1532_v2 = vld [vmem:[%s2212_s1 + $0x8] sm:$0xff] (!%p155_p10)   ;;  %vm386_vm1 = vcmask (!%p155_p10), 1046532  }
   0xf   : > { %158 = sbr.rel (%p155_p10) target bundleno = 587 (0x24b), region = 32  ;;  %1073 = vmatprep.subr.bf16.mxu0 (!%p155_p10), %v1620_v0  ;;  %1439 = vmatprep.subr.bf16.mxu1 (!%p155_p10), %v1620_v0  ;;  %v1533_v11 = vld [vmem:[%s2212_s1 + $0x10] sm:$0xff] (!%p155_p10)   ;;  %s1621_s10 = smov (!%p155_p10), 48   ;;  %vm1755_vm2 = vmor (!%p155_p10), %vm385_vm0, %vm386_vm1  ;;  %vm233_vm3 = vsmask.f32 (!%p155_p10), 3328  ;;  %v1534_v37 = vld [vmem:[%s2212_s1 + $0x18] sm:$0xff] (!%p155_p10)  }
  0x10   : > { %1074 = vmatpush1.bf16.msra.mxu0 (!%p155_p10), %v1531_v1  ;;  %1448 = vmatpush1.bf16.msra.mxu1 (!%p155_p10), %v1531_v1  ;;  %vm234_vm4 = vsmask.f32 (!%p155_p10), 7440  ;;  %s1622_s19 = smov (!%p155_p10), 96   ;;  %s1623_s21 = smov (!%p155_p10), 32   ;;  %v1535_v58 = vld [vmem:[%s2212_s1 + $0x20] sm:$0xff] (!%p155_p10)   ;;  %vm228_vm6 = vcmask (!%p155_p10), 130048  }
  0x11   : > { %1075 = vmatprep.subr.bf16.mxu0 (!%p155_p10), %v1620_v0  ;;  %1440 = vmatprep.subr.bf16.mxu1 (!%p155_p10), %v1620_v0  ;;  %s1624_s27 = smov (!%p155_p10), 80   ;;  %vm1851_vm5 = vmor (!%p155_p10), %vm233_vm3, %vm234_vm4  ;;  %s1625_s5 = smov (!%p155_p10), 64   ;;  %vm372_vm7 = vcmask (!%p155_p10), 261248   ;;  %vm444_vm8 = vcmask (!%p155_p10), 392448   ;;  %vm501_vm9 = vcmask (!%p155_p10), 523648   ;;  %vm642_vm10 = vcmask (!%p155_p10), 654848  }
  0x12   : > { %s1626_s9 = smov (!%p155_p10), 16   ;;  %s1627_s23 = smov (!%p155_p10), 112   ;;  %vm711_vm11 = vcmask (!%p155_p10), 786048   ;;  %vm768_vm12 = vcmask (!%p155_p10), 917248   ;;  %vm909_vm13 = vcmask (!%p155_p10), 1048448  }
  0x13   : > { %s1438_s28 = sshll.u32 (!%p155_p10), %s1610_s15, 8 }
  0x14   : > { %1076 = vmatpush1.bf16.msra.mxu0 (!%p155_p10), %v1532_v2  ;;  %1449 = vmatpush1.bf16.msra.mxu1 (!%p155_p10), %v1532_v2  ;;  %s2160_s4 = scalar_lea.hbm (!%p155_p10), %s2214_s3, %s1438_s28 }
  0x15   : > { %1077 = vmatprep.subr.bf16.mxu0 (!%p155_p10), %v1620_v0  ;;  %1441 = vmatprep.subr.bf16.mxu1 (!%p155_p10), %v1620_v0 }
  0x16   : > { %s179_s26 = scalar_select %p178_p11, %s1610_s15, 1 }
  0x17   : > { %s1628_s15 = smov [#allocation3]  }
  0x18   : > { %s1457_s29 = smul.u32 80, %s179_s26  ;;  %1078 = vmatpush1.bf16.msra.mxu0 %v1533_v11  ;;  %1450 = vmatpush1.bf16.msra.mxu1 %v1533_v11 }
  0x19   : > { %1079 = vmatprep.subr.bf16.mxu0 %v1620_v0  ;;  %1442 = vmatprep.subr.bf16.mxu1 %v1620_v0 }
  0x1a   : > { %s1718_s7 = scalar_lea.vmem %s2211_s0, %s1457_s29 }
  0x1b   : > { %v1339_v3 = vld [vmem:[%s1718_s7 + $0x8] sm:$0xf]  ;;  %v1724_v4 = vld [vmem:[%s1718_s7 + $0x10] sm:$0xf]  ;;  %v1727_v5 = vld [vmem:[%s1718_s7] sm:$0xf] }
  0x1c   : > { %v1355_v6 = vcombine.low %v1339_v3, %v1724_v4  ;;  %v507_v7 = vshrl.u32 %v1339_v3, 16  ;;  %v510_v8 = vshll.u32 %v1339_v3, 16  ;;  %v521_v9 = vshrl.u32 %v1724_v4, 16  ;;  %v1732_v10 = vld [vmem:[%s1718_s7 + $0x4] sm:$0x1]  ;;  %1080 = vmatpush1.bf16.msra.mxu0 %v1534_v37  ;;  %1451 = vmatpush1.bf16.msra.mxu1 %v1534_v37 }
  0x1d   : > { %v524_v12 = vshll.u32 %v1724_v4, 16  ;;  %v1739_v13 = vld [vmem:[%s1718_s7 + $0x8] sm:$0xf]  ;;  %v1742_v14 = vld [vmem:[%s1718_s7 + $0xc] sm:$0x1]  ;;  %v246_v15 = vshll.u32 %v1732_v10, 16  ;;  %1081 = vmatprep.subr.bf16.mxu0 %v1620_v0  ;;  %1443 = vmatprep.subr.bf16.mxu1 %v1620_v0 }
  0x1e   : > { %v1745_v16 = vrot.slane %v507_v7, 4  ;;  %v1747_v17 = vrot.slane %v510_v8, 5  ;;  %v1749_v18 = vrot.slane %v521_v9, 4  ;;  %489 = vrot.lane.b32.xlu1 %v1355_v6, %s1621_s10  ;;  %v260_v19 = vshll.u32 %v1742_v14, 16  ;;  %v1760_v21 = vld [vmem:[%s1718_s7 + $0x10] sm:$0xf] }
  0x1f   : > { %v1763_v22 = vrot.slane %v524_v12, 5  ;;  %v1327_v23 = vrot.slane %v1727_v5, 9  ;;  %v390_v24 = vrot.slane %v1732_v10, 5  ;;  %v1328_v25 = vrot.slane %v1739_v13, 9  ;;  %v1769_v26 = vld [vmem:[%s1718_s7 + $0x18] sm:$0xf] }
  0x20   : > { %v394_v27 = vrot.slane %v1742_v14, 5  ;;  %v1391_v28 = vcombine.low %v1760_v21, %v1769_v26  ;;  %v774_v29 = vshrl.u32 %v1760_v21, 16  ;;  %v777_v30 = vshll.u32 %v1760_v21, 16  ;;  %v1778_v31 = vld [vmem:[%s1718_s7 + $0xc] sm:$0x1]  ;;  %1082 = vmatpush1.bf16.msra.mxu0 %v1535_v58  ;;  %1452 = vmatpush1.bf16.msra.mxu1 %v1535_v58 }
  0x21   : > { %v391_v32 = vsel %vm1755_vm2, %v1327_v23, %v390_v24  ;;  %v788_v33 = vshrl.u32 %v1769_v26, 16  ;;  %v791_v34 = vshll.u32 %v1769_v26, 16  ;;  %v1399_v35 = vrot.slane %v1760_v21, 9  ;;  %v1786_v36 = vld [vmem:[%s1718_s7 + $0x14] sm:$0x1]  ;;  %1083 = vmatprep.subr.bf16.mxu0 %v1620_v0  ;;  %1444 = vmatprep.subr.bf16.mxu1 %v1620_v0 }
  0x22   : > { %v395_v38 = vsel %vm1755_vm2, %v1328_v25, %v394_v27  ;;  %v1400_v39 = vrot.slane %v1769_v26, 9  ;;  %756 = vrot.lane.b32.xlu1 %v1391_v28, %s1622_s19  ;;  %v1363_v40 = vrot.slane %v1339_v3, 9  ;;  %v657_v41 = vrot.slane %v1778_v31, 5  ;;  %v1797_v42 = vld [vmem:[%s1718_s7 + $0x10] sm:$0xf] }
  0x23   : > { %v1335_v43 = vcombine.low %v391_v32, %v395_v38  ;;  %v1364_v44 = vrot.slane %v1724_v4, 9  ;;  %v661_v45 = vrot.slane %v1786_v36, 5  ;;  %v1803_v46 = vld [vmem:[%s1718_s7 + $0x14] sm:$0x1]  ;;  %v1806_v47 = vld [vmem:[%s1718_s7 + $0x18] sm:$0xf]  ;;  %v513_v48 = vor.u32 %v1747_v17, %v1745_v16 }
  0x24   : > { %v658_v49 = vsel %vm1755_vm2, %v1363_v40, %v657_v41  ;;  %v1814_v50 = vld [vmem:[%s1718_s7 + $0x1c] sm:$0x1]  ;;  %v1329_v51 = vrot.slane %v1797_v42, 9  ;;  %v398_v52 = vrot.slane %v1803_v46, 5  ;;  %v1330_v53 = vrot.slane %v1806_v47, 9  ;;  %v1536_v16 = vld [vmem:[%s2212_s1 + $0x28] sm:$0xff]  }
  0x25   : > { %432 = vrot.lane.b32.xlu0 %v1335_v43, %s1623_s21  ;;  %v662_v54 = vsel %vm1755_vm2, %v1364_v44, %v661_v45  ;;  %v402_v55 = vrot.slane %v1814_v50, 5  ;;  %v237_v56 = vshrl.u32 %v1727_v5, 16  ;;  %v240_v57 = vshll.u32 %v1727_v5, 16  ;;  %v1376_v4 = vld [vmem:[%s1718_s7 + $0x14] sm:$0x1]  ;;  %1084 = vmatpush1.bf16.msra.mxu0 %v1536_v16 }
  0x26   : > { %v1371_v59 = vcombine.low %v658_v49, %v662_v54  ;;  %v399_v60 = vsel %vm1755_vm2, %v1329_v51, %v398_v52  ;;  %v248_v61 = vrot.slane %v246_v15, 5  ;;  %v251_v62 = vshrl.u32 %v1739_v13, 16  ;;  %v1378_v28 = vld [vmem:[%s1718_s7 + $0x1c] sm:$0x1]  ;;  %v1537_v41 = vld [vmem:[%s2212_s1 + $0x30] sm:$0xff]   ;;  %1085 = vmatprep.subr.bf16.mxu0 %v1620_v0  ;;  %1453 = vmatpush1.bf16.msra.mxu1 %v1536_v16 }
  0x27   : > { %v403_v63 = vsel %vm1755_vm2, %v1330_v53, %v402_v55  ;;  %v239_v1 = vrot.slane %v237_v56, 4  ;;  %v242_v2 = vrot.slane %v240_v57, 5  ;;  %v254_v3 = vshll.u32 %v1739_v13, 16  ;;  %1445 = vmatprep.subr.bf16.mxu1 %v1620_v0  ;;  %v1894_v21 = vld [vmem:[%s1718_s7 + $0x20] sm:$0xf] }
  0x28   : > { %v1336_v6 = vcombine.low %v399_v60, %v403_v63  ;;  %v253_v7 = vrot.slane %v251_v62, 4  ;;  %v262_v8 = vrot.slane %v260_v19, 5  ;;  %v514_v9 = vrot.slane %v513_v48, 4  ;;  %v1904_v62 = vld [vmem:[%s1718_s7 + $0x24] sm:$0x1] }
  0x29   : > { %699 = vrot.lane.b32.xlu0 %v1371_v59, %s1624_s27  ;;  %v243_v10 = vor.u32 %v242_v2, %v239_v1  ;;  %v256_v11 = vrot.slane %v254_v3, 5  ;;  %v516_v12 = vshll.u32 %v1778_v31, 16  ;;  %v527_v15 = vor.u32 %v1763_v22, %v1749_v18  ;;  %1086 = vmatpush1.bf16.msra.mxu0 %v1537_v41 }
  0x2a   : > { %434 = vrot.lane.b32.xlu1 %v1336_v6, %s1623_s21  ;;  %v530_v17 = vshll.u32 %v1786_v36, 16  ;;  %v776_v19 = vrot.slane %v774_v29, 4  ;;  %v779_v18 = vrot.slane %v777_v30, 5  ;;  %v783_v22 = vshll.u32 %v1376_v4, 16  ;;  %1087 = vmatprep.subr.bf16.mxu0 %v1620_v0 }
  0x2b   : > { %v244_v23 = vrot.slane %v243_v10, 4  ;;  %v257_v24 = vor.u32 %v256_v11, %v253_v7  ;;  %v518_v25 = vrot.slane %v516_v12, 5  ;;  %v528_v27 = vrot.slane %v527_v15, 4  ;;  %1454 = vmatpush1.bf16.msra.mxu1 %v1537_v41  ;;  %v1539_v15 = vld [vmem:[%s2212_s1 + $0x40] sm:$0xff]  }
  0x2c   : > { %v532_v31 = vrot.slane %v530_v17, 5  ;;  %v780_v32 = vor.u32 %v779_v18, %v776_v19  ;;  %v785_v37 = vrot.slane %v783_v22, 5  ;;  %v790_v36 = vrot.slane %v788_v33, 4  ;;  %1446 = vmatprep.subr.bf16.mxu1 %v1620_v0 }
  0x2d   : > { %v249_v29 = vsel %vm1851_vm5, %v244_v23, %v248_v61  ;;  %v258_v30 = vrot.slane %v257_v24, 4  ;;  %v519_v38 = vsel %vm1851_vm5, %v514_v9, %v518_v25  ;;  %v793_v40 = vrot.slane %v791_v34, 5  ;;  %v1915_v9 = vld [vmem:[%s1718_s7 + $0x2c] sm:$0x1] }
  0x2e   : > { %v533_v33 = vsel %vm1851_vm5, %v528_v27, %v532_v31  ;;  %v781_v43 = vrot.slane %v780_v32, 4  ;;  %v797_v44 = vshll.u32 %v1378_v28, 16  ;;  %v924_v45 = vrot.slane %v1376_v4, 5  ;;  %v1911_v4 = vld [vmem:[%s1718_s7 + $0x28] sm:$0xf] }
  0x2f   : > { %v263_v48 = vsel %vm1851_vm5, %v258_v30, %v262_v8  ;;  %v1359_v49 = vcombine.low %v519_v38, %v533_v33  ;;  %v794_v51 = vor.u32 %v793_v40, %v790_v36  ;;  %v928_v34 = vrot.slane %v1378_v28, 5  ;;  %v1930_v27 = vld [vmem:[%s1718_s7 + $0x18] sm:$0xf]  ;;  %v1933_v36 = vld [vmem:[%s1718_s7 + $0x20] sm:$0xf] }
  0x30   : > { %v1323_v52 = vcombine.low %v249_v29, %v263_v48  ;;  %v786_v53 = vsel %vm1851_vm5, %v781_v43, %v785_v37  ;;  %v799_v54 = vrot.slane %v797_v44, 5  ;;  %v925_v55 = vsel %vm1755_vm2, %v1399_v35, %v924_v45  ;;  %v1538_v35 = vld [vmem:[%s2212_s1 + $0x38] sm:$0xff]  }
  0x31   : > { %630 = vrot.lane.b32.xlu1 %v1359_v49, %s1625_s5  ;;  %v795_v56 = vrot.slane %v794_v51, 4  ;;  %v929_v57 = vsel %vm1755_vm2, %v1400_v39, %v928_v34  ;;  %v265_v58 = vshrl.u32 %v1797_v42, 16  ;;  %v268_v59 = vshll.u32 %v1797_v42, 16  ;;  %1088 = vmatpush1.bf16.msra.mxu0 %v1538_v35  ;;  %v1344_v51 = vld [vmem:[%s1718_s7 + $0x1c] sm:$0x1] }
  0x32   : > { %360 = vrot.lane.b32.xlu0 %v1323_v52, %s1626_s9  ;;  %v1407_v60 = vcombine.low %v925_v55, %v929_v57  ;;  %v274_v26 = vshll.u32 %v1803_v46, 16  ;;  %v279_v39 = vshrl.u32 %v1806_v47, 16  ;;  %v282_v61 = vshll.u32 %v1806_v47, 16  ;;  %1089 = vmatprep.subr.bf16.mxu0 %v1620_v0 }
  0x33   : > { %v800_v63 = vsel %vm1851_vm5, %v795_v56, %v799_v54  ;;  %v267_v1 = vrot.slane %v265_v58, 4  ;;  %v270_v2 = vrot.slane %v268_v59, 5  ;;  %v288_v3 = vshll.u32 %v1814_v50, 16  ;;  %1455 = vmatpush1.bf16.msra.mxu1 %v1538_v35  ;;  %v1346_v58 = vld [vmem:[%s1718_s7 + $0x24] sm:$0x1] }
  0x34   : > { %v1395_v46 = vcombine.low %v786_v53, %v800_v63  ;;  %970 = vst.msk [vmem:[#allocation2 + $0x8] sm:$0xff] %vm228_vm6, %v1407_v60  ;;  %v276_v6 = vrot.slane %v274_v26, 5  ;;  %v281_v7 = vrot.slane %v279_v39, 4  ;;  %v284_v8 = vrot.slane %v282_v61, 5  ;;  %1447 = vmatprep.subr.bf16.mxu1 %v1620_v0  ;;  %v1964_v63 = vld [vmem:[%s1718_s7 + $0x30] sm:$0xf] }
  0x35   : > { %v271_v10 = vor.u32 %v270_v2, %v267_v1  ;;  %v290_v11 = vrot.slane %v288_v3, 5  ;;  %v293_v12 = vshrl.u32 %v1894_v21, 16  ;;  %v296_v50 = vshll.u32 %v1894_v21, 16  ;;  %1090 = vmatpush1.bf16.msra.mxu0 %v1539_v15 }
  0x36   : > { %897 = vrot.lane.b32.xlu0 %v1395_v46, %s1627_s23  ;;  %v285_v16 = vor.u32 %v284_v8, %v281_v7  ;;  %v302_v17 = vshll.u32 %v1904_v62, 16  ;;  %v307_v19 = vshrl.u32 %v1911_v4, 16  ;;  %v310_v18 = vshll.u32 %v1911_v4, 16 }
  0x37   : > { %v272_v22 = vrot.slane %v271_v10, 4  ;;  %v295_v23 = vrot.slane %v293_v12, 4  ;;  %v298_v24 = vrot.slane %v296_v50, 5  ;;  %v316_v25 = vshll.u32 %v1915_v9, 16  ;;  %1456 = vmatpush1.bf16.msra.mxu1 %v1539_v15 }
  0x38   : > { %v286_v28 = vrot.slane %v285_v16, 4  ;;  %v304_v31 = vrot.slane %v302_v17, 5  ;;  %v309_v32 = vrot.slane %v307_v19, 4  ;;  %v312_v37 = vrot.slane %v310_v18, 5 }
  0x39   : > { %v277_v29 = vsel %vm1851_vm5, %v272_v22, %v276_v6  ;;  %v299_v30 = vor.u32 %v298_v24, %v295_v23  ;;  %v318_v38 = vrot.slane %v316_v25, 5  ;;  %v1356_v40 = vcombine.low %v1930_v27, %v1933_v36  ;;  %v1969_v6 = vld [vmem:[%s1718_s7 + $0x2c] sm:$0x1]  ;;  %v1350_v22 = vld [vmem:[%s1718_s7 + $0x34] sm:$0x1] }
  0x3a   : > { %v291_v41 = vsel %vm1851_vm5, %v286_v28, %v290_v11  ;;  %v313_v33 = vor.u32 %v312_v37, %v309_v32  ;;  %v535_v43 = vshrl.u32 %v1930_v27, 16  ;;  %v538_v44 = vshll.u32 %v1930_v27, 16 }
  0x3b   : > { %v1324_v45 = vcombine.low %v277_v29, %v291_v41  ;;  %v300_v0 = vrot.slane %v299_v30, 4  ;;  %v549_v48 = vshrl.u32 %v1933_v36, 16  ;;  %v552_v49 = vshll.u32 %v1933_v36, 16  ;;  %v975_v34 = vld [vmem:[#allocation2 + $0x8] sm:$0xff] }
  0x3c   : > { %v314_v52 = vrot.slane %v313_v33, 4  ;;  %v1331_v53 = vrot.slane %v1894_v21, 9  ;;  %v406_v54 = vrot.slane %v1904_v62, 5  ;;  %v1332_v55 = vrot.slane %v1911_v4, 9  ;;  %1421 = vmatprep.mubr.msk.bf16.mxu0 %vm228_vm6, %v975_v34  ;;  %v1961_v62 = vld [vmem:[%s1718_s7 + $0x28] sm:$0xf] }
  0x3d   : > { %362 = vrot.lane.b32.xlu1 %v1324_v45, %s1626_s9  ;;  %v305_v56 = vsel %vm1851_vm5, %v300_v0, %v304_v31  ;;  %v410_v57 = vrot.slane %v1915_v9, 5  ;;  %v537_v59 = vrot.slane %v535_v43, 4  ;;  %v540_v35 = vrot.slane %v538_v44, 5  ;;  %v1985_v31 = vld [vmem:[%s1718_s7 + $0x20] sm:$0xf] }
  0x3e   : > { %v319_v60 = vsel %vm1851_vm5, %v314_v52, %v318_v38  ;;  %v407_v26 = vsel %vm1755_vm2, %v1331_v53, %v406_v54  ;;  %v544_v39 = vshll.u32 %v1344_v51, 16  ;;  %v551_v61 = vrot.slane %v549_v48, 4  ;;  %v1381_v33 = vld [vmem:[%s1718_s7 + $0x28] sm:$0xf] }
  0x3f   : > { %v1325_v1 = vcombine.low %v305_v56, %v319_v60  ;;  %v411_v2 = vsel %vm1755_vm2, %v1332_v55, %v410_v57  ;;  %v541_v3 = vor.u32 %v540_v35, %v537_v59  ;;  %v554_v46 = vrot.slane %v552_v49, 5  ;;  %v1380_v59 = vld [vmem:[%s1718_s7 + $0x24] sm:$0x1] }
  0x40   : > { %v1337_v7 = vcombine.low %v407_v26, %v411_v2  ;;  %v546_v8 = vrot.slane %v544_v39, 5  ;;  %v558_v9 = vshll.u32 %v1346_v58, 16  ;;  %v1357_v10 = vcombine.low %v1961_v62, %v1964_v63 }
  0x41   : > { %364 = vrot.lane.b32.xlu0 %v1325_v1, %s1626_s9  ;;  %491 = vrot.lane.b32.xlu1 %v1356_v40, %s1621_s10  ;;  %v542_v11 = vrot.slane %v541_v3, 4  ;;  %v555_v12 = vor.u32 %v554_v46, %v551_v61  ;;  %v563_v50 = vshrl.u32 %v1961_v62, 16  ;;  %v566_v15 = vshll.u32 %v1961_v62, 16  ;;  %v1382_v61 = vld [vmem:[%s1718_s7 + $0x2c] sm:$0x1] }
  0x42   : > { %v560_v16 = vrot.slane %v558_v9, 5  ;;  %v577_v17 = vshrl.u32 %v1964_v63, 16  ;;  %v580_v19 = vshll.u32 %v1964_v63, 16  ;;  %v1365_v18 = vrot.slane %v1930_v27, 9 }
  0x43   : > { %v547_v23 = vsel %vm1851_vm5, %v542_v11, %v546_v8  ;;  %v556_v24 = vrot.slane %v555_v12, 4  ;;  %v665_v25 = vrot.slane %v1344_v51, 5  ;;  %v1366_v28 = vrot.slane %v1933_v36, 9 }
  0x44   : > { %v669_v32 = vrot.slane %v1346_v58, 5  ;;  %v565_v37 = vrot.slane %v563_v50, 4  ;;  %v568_v29 = vrot.slane %v566_v15, 5  ;;  %v572_v30 = vshll.u32 %v1969_v6, 16  ;;  %v1383_v50 = vld [vmem:[%s1718_s7 + $0x30] sm:$0xf] }
  0x45   : > { %436 = vrot.lane.b32.xlu0 %v1337_v7, %s1623_s21  ;;  %v561_v27 = vsel %vm1851_vm5, %v556_v24, %v560_v16  ;;  %v666_v38 = vsel %vm1755_vm2, %v1365_v18, %v665_v25  ;;  %v579_v40 = vrot.slane %v577_v17, 4  ;;  %v582_v41 = vrot.slane %v580_v19, 5  ;;  %v1385_v19 = vld [vmem:[%s1718_s7 + $0x38] sm:$0xf] }
  0x46   : > { %v1360_v43 = vcombine.low %v547_v23, %v561_v27  ;;  %v670_v36 = vsel %vm1755_vm2, %v1366_v28, %v669_v32  ;;  %v569_v44 = vor.u32 %v568_v29, %v565_v37  ;;  %v574_v45 = vrot.slane %v572_v30, 5  ;;  %v1384_v37 = vld [vmem:[%s1718_s7 + $0x34] sm:$0x1] }
  0x47   : > { %v1372_v0 = vcombine.low %v666_v38, %v670_v36  ;;  %v583_v48 = vor.u32 %v582_v41, %v579_v40  ;;  %v586_v49 = vshll.u32 %v1350_v22, 16  ;;  %v1392_v51 = vcombine.low %v1985_v31, %v1381_v33  ;;  %v1386_v40 = vld [vmem:[%s1718_s7 + $0x3c] sm:$0x1] }
  0x48   : > { %632 = vrot.lane.b32.xlu1 %v1360_v43, %s1625_s5  ;;  %v570_v34 = vrot.slane %v569_v44, 4  ;;  %v802_v52 = vshrl.u32 %v1985_v31, 16  ;;  %v805_v53 = vshll.u32 %v1985_v31, 16  ;;  %v816_v54 = vshrl.u32 %v1381_v33, 16 }
  0x49   : > { %493 = vrot.lane.b32.xlu0 %v1357_v10, %s1621_s10  ;;  %v584_v55 = vrot.slane %v583_v48, 4  ;;  %v588_v56 = vrot.slane %v586_v49, 5  ;;  %v819_v57 = vshll.u32 %v1381_v33, 16  ;;  %v1401_v58 = vrot.slane %v1985_v31, 9  ;;  %v2032_v49 = vld [vmem:[%s1718_s7 + $0x30] sm:$0xf] }
  0x4a   : > { %v575_v35 = vsel %vm1851_vm5, %v570_v34, %v574_v45  ;;  %v1402_v60 = vrot.slane %v1381_v33, 9  ;;  %v1367_v26 = vrot.slane %v1961_v62, 9  ;;  %v673_v39 = vrot.slane %v1969_v6, 5 }
  0x4b   : > { %v589_v1 = vsel %vm1851_vm5, %v584_v55, %v588_v56  ;;  %v1368_v2 = vrot.slane %v1964_v63, 9  ;;  %v677_v3 = vrot.slane %v1350_v22, 5  ;;  %v804_v46 = vrot.slane %v802_v52, 4 }
  0x4c   : > { %701 = vrot.lane.b32.xlu1 %v1372_v0, %s1624_s27  ;;  %v1361_v7 = vcombine.low %v575_v35, %v589_v1  ;;  %v674_v8 = vsel %vm1755_vm2, %v1367_v26, %v673_v39  ;;  %v807_v9 = vrot.slane %v805_v53, 5  ;;  %v811_v62 = vshll.u32 %v1380_v59, 16 }
  0x4d   : > { %v678_v6 = vsel %vm1755_vm2, %v1368_v2, %v677_v3  ;;  %v818_v10 = vrot.slane %v816_v54, 4  ;;  %v821_v11 = vrot.slane %v819_v57, 5  ;;  %v825_v12 = vshll.u32 %v1382_v61, 16  ;;  %v201_v54 = vld [vmem:[%s1718_s7 + $0x34] sm:$0x1] }
  0x4e   : > { %634 = vrot.lane.b32.xlu0 %v1361_v7, %s1625_s5  ;;  %v1373_v63 = vcombine.low %v674_v8, %v678_v6  ;;  %v808_v15 = vor.u32 %v807_v9, %v804_v46  ;;  %v813_v16 = vrot.slane %v811_v62, 5  ;;  %v932_v17 = vrot.slane %v1380_v59, 5  ;;  %v203_v3 = vld [vmem:[%s1718_s7 + $0x3c] sm:$0x1] }
  0x4f   : > { %v822_v18 = vor.u32 %v821_v11, %v818_v10  ;;  %v827_v22 = vrot.slane %v825_v12, 5  ;;  %v936_v23 = vrot.slane %v1382_v61, 5  ;;  %v1393_v24 = vcombine.low %v1383_v50, %v1385_v19 }
  0x50   : > { %758 = vrot.lane.b32.xlu1 %v1392_v51, %s1622_s19  ;;  %v809_v25 = vrot.slane %v808_v15, 4  ;;  %v933_v28 = vsel %vm1755_vm2, %v1401_v58, %v932_v17  ;;  %v830_v31 = vshrl.u32 %v1383_v50, 16  ;;  %v833_v32 = vshll.u32 %v1383_v50, 16  ;;  %v2057_v17 = vld [vmem:[%s1718_s7 + $0x38] sm:$0xf] }
  0x51   : > { %v823_v29 = vrot.slane %v822_v18, 4  ;;  %v937_v30 = vsel %vm1755_vm2, %v1402_v60, %v936_v23  ;;  %v844_v27 = vshrl.u32 %v1385_v19, 16  ;;  %v847_v38 = vshll.u32 %v1385_v19, 16  ;;  %v2039_v60 = vld [vmem:[%s1718_s7 + $0x38] sm:$0xf] }
  0x52   : > { %703 = vrot.lane.b32.xlu0 %v1373_v63, %s1624_s27  ;;  %v814_v41 = vsel %vm1851_vm5, %v809_v25, %v813_v16  ;;  %v1408_v33 = vcombine.low %v933_v28, %v937_v30  ;;  %v1403_v43 = vrot.slane %v1383_v50, 9  ;;  %v1404_v36 = vrot.slane %v1385_v19, 9 }
  0x53   : > { %v828_v44 = vsel %vm1851_vm5, %v823_v29, %v827_v22  ;;  %v832_v45 = vrot.slane %v830_v31, 4  ;;  %v835_v0 = vrot.slane %v833_v32, 5  ;;  %v839_v48 = vshll.u32 %v1384_v37, 16 }
  0x54   : > { %v1396_v51 = vcombine.low %v814_v41, %v828_v44  ;;  %971 = vst.msk [vmem:[#allocation2 + $0x18] sm:$0xff] %vm228_vm6, %v1408_v33  ;;  %v846_v34 = vrot.slane %v844_v27, 4  ;;  %v849_v52 = vrot.slane %v847_v38, 5  ;;  %v853_v53 = vshll.u32 %v1386_v40, 16  ;;  %v1352_v27 = vld [vmem:[%s1718_s7 + $0x3c] sm:$0x1] }
  0x55   : > { %v836_v55 = vor.u32 %v835_v0, %v832_v45  ;;  %v841_v56 = vrot.slane %v839_v48, 5  ;;  %v940_v57 = vrot.slane %v1384_v37, 5  ;;  %v944_v58 = vrot.slane %v1386_v40, 5  ;;  %v1354_v38 = vld [vmem:[%s1718_s7 + $0x44] sm:$0x1] }
  0x56   : > { %899 = vrot.lane.b32.xlu1 %v1396_v51, %s1627_s23  ;;  %760 = vrot.lane.b32.xlu0 %v1393_v24, %s1622_s19  ;;  %v850_v59 = vor.u32 %v849_v52, %v846_v34  ;;  %v855_v35 = vrot.slane %v853_v53, 5  ;;  %v321_v26 = vshrl.u32 %v2032_v49, 16  ;;  %v324_v39 = vshll.u32 %v2032_v49, 16  ;;  %v1353_v24 = vld [vmem:[%s1718_s7 + $0x40] sm:$0xf] }
  0x57   : > { %v837_v61 = vrot.slane %v836_v55, 4  ;;  %v941_v1 = vsel %vm1755_vm2, %v1403_v43, %v940_v57  ;;  %v945_v2 = vsel %vm1755_vm2, %v1404_v36, %v944_v58  ;;  %v330_v46 = vshll.u32 %v201_v54, 16  ;;  %v1387_v57 = vld [vmem:[%s1718_s7 + $0x40] sm:$0xf] }
  0x58   : > { %v851_v7 = vrot.slane %v850_v59, 4  ;;  %v1409_v8 = vcombine.low %v941_v1, %v945_v2  ;;  %v323_v9 = vrot.slane %v321_v26, 4  ;;  %v326_v62 = vrot.slane %v324_v39, 5 }
  0x59   : > { %v842_v6 = vsel %vm1851_vm5, %v837_v61, %v841_v56  ;;  %v332_v10 = vrot.slane %v330_v46, 5  ;;  %v335_v11 = vshrl.u32 %v2039_v60, 16  ;;  %v338_v12 = vshll.u32 %v2039_v60, 16  ;;  %v1389_v61 = vld [vmem:[%s1718_s7 + $0x48] sm:$0xf] }
  0x5a   : > { %v856_v50 = vsel %vm1851_vm5, %v851_v7, %v855_v35  ;;  %972 = vst.msk [vmem:[#allocation2 + $0x28] sm:$0xff] %vm228_vm6, %v1409_v8  ;;  %v327_v63 = vor.u32 %v326_v62, %v323_v9  ;;  %v344_v15 = vshll.u32 %v203_v3, 16  ;;  %v1333_v16 = vrot.slane %v2032_v49, 9 }
  0x5b   : > { %v1397_v19 = vcombine.low %v842_v6, %v856_v50  ;;  %v337_v18 = vrot.slane %v335_v11, 4  ;;  %v340_v22 = vrot.slane %v338_v12, 5  ;;  %v414_v23 = vrot.slane %v201_v54, 5  ;;  %v1388_v6 = vld [vmem:[%s1718_s7 + $0x44] sm:$0x1] }
  0x5c   : > { %v328_v25 = vrot.slane %v327_v63, 4  ;;  %v1334_v28 = vrot.slane %v2039_v60, 9  ;;  %v418_v31 = vrot.slane %v203_v3, 5  ;;  %v346_v37 = vrot.slane %v344_v15, 5  ;;  %v1390_v63 = vld [vmem:[%s1718_s7 + $0x4c] sm:$0x1] }
  0x5d   : > { %901 = vrot.lane.b32.xlu0 %v1397_v19, %s1627_s23  ;;  %v341_v32 = vor.u32 %v340_v22, %v337_v18  ;;  %v415_v29 = vsel %vm1755_vm2, %v1333_v16, %v414_v23  ;;  %v591_v30 = vshrl.u32 %v2057_v17, 16  ;;  %v594_v33 = vshll.u32 %v2057_v17, 16 }
  0x5e   : > { %v333_v40 = vsel %vm1851_vm5, %v328_v25, %v332_v10  ;;  %v419_v41 = vsel %vm1755_vm2, %v1334_v28, %v418_v31  ;;  %v605_v43 = vshrl.u32 %v1353_v24, 16  ;;  %v608_v45 = vshll.u32 %v1353_v24, 16 }
  0x5f   : > { %v342_v36 = vrot.slane %v341_v32, 4  ;;  %v1338_v44 = vcombine.low %v415_v29, %v419_v41  ;;  %v593_v0 = vrot.slane %v591_v30, 4  ;;  %v596_v48 = vrot.slane %v594_v33, 5 }
  0x60   : > { %v600_v51 = vshll.u32 %v1352_v27, 16  ;;  %v607_v34 = vrot.slane %v605_v43, 4  ;;  %v614_v52 = vshll.u32 %v1354_v38, 16  ;;  %v610_v54 = vrot.slane %v608_v45, 5 }
  0x61   : > { %v347_v53 = vsel %vm1851_vm5, %v342_v36, %v346_v37  ;;  %438 = vrot.lane.b32.xlu0 %v1338_v44, %s1623_s21  ;;  %v1369_v55 = vrot.slane %v2057_v17, 9  ;;  %v681_v56 = vrot.slane %v1352_v27, 5  ;;  %v979_v58 = vld [vmem:[#allocation2 + $0x28] sm:$0xff]  ;;  %v597_v35 = vor.u32 %v596_v48, %v593_v0 }
  0x62   : > { %v1326_v59 = vcombine.low %v333_v40, %v347_v53  ;;  %v602_v26 = vrot.slane %v600_v51, 5  ;;  %v616_v39 = vrot.slane %v614_v52, 5  ;;  %1423 = vmatprep.mubr.msk.bf16.mxu1 %vm228_vm6, %v979_v58  ;;  %v611_v1 = vor.u32 %v610_v54, %v607_v34 }
  0x63   : > { %v682_v2 = vsel %vm1755_vm2, %v1369_v55, %v681_v56  ;;  %v1370_v3 = vrot.slane %v1353_v24, 9  ;;  %v685_v46 = vrot.slane %v1354_v38, 5  ;;  %v1358_v7 = vcombine.low %v2057_v17, %v1353_v24 }
  0x64   : > { %366 = vrot.lane.b32.xlu1 %v1326_v59, %s1626_s9  ;;  %v598_v8 = vrot.slane %v597_v35, 4  ;;  %v858_v9 = vshrl.u32 %v1387_v57, 16  ;;  %v861_v62 = vshll.u32 %v1387_v57, 16  ;;  %v612_v10 = vrot.slane %v611_v1, 4  ;;  %s1544_s9 = sshll.u32 %s1628_s15, 4  ;;  %s1545_s9 = int_to_ptr.vmem [resolvable:$false] %s1544_s9 }
  0x65   : > { %v686_v11 = vsel %vm1755_vm2, %v1370_v3, %v685_v46  ;;  %v872_v12 = vshrl.u32 %v1389_v61, 16  ;;  %v875_v50 = vshll.u32 %v1389_v61, 16  ;;  %v1405_v19 = vrot.slane %v1387_v57, 9  ;;  %s1546_s11 = scalar_lea.vmem %s1545_s9, 512 }
  0x66   : > { %v603_v15 = vsel %vm1851_vm5, %v598_v8, %v602_v26  ;;  %v1374_v16 = vcombine.low %v682_v2, %v686_v11  ;;  %v1406_v18 = vrot.slane %v1389_v61, 9  ;;  %v617_v17 = vsel %vm1851_vm5, %v612_v10, %v616_v39 }
  0x67   : > { %v860_v22 = vrot.slane %v858_v9, 4  ;;  %v863_v23 = vrot.slane %v861_v62, 5  ;;  %v867_v24 = vshll.u32 %v1388_v6, 16  ;;  %v1362_v25 = vcombine.low %v603_v15, %v617_v17 }
  0x68   : > { %495 = vrot.lane.b32.xlu1 %v1358_v7, %s1621_s10  ;;  %v874_v28 = vrot.slane %v872_v12, 4  ;;  %v877_v31 = vrot.slane %v875_v50, 5  ;;  %v881_v32 = vshll.u32 %v1390_v63, 16  ;;  %v948_v30 = vrot.slane %v1388_v6, 5 }
  0x69   : > { %v864_v37 = vor.u32 %v863_v23, %v860_v22  ;;  %v869_v29 = vrot.slane %v867_v24, 5  ;;  %v952_v27 = vrot.slane %v1390_v63, 5  ;;  %636 = vrot.lane.b32.xlu0 %v1362_v25, %s1625_s5  ;;  %v1394_v38 = vcombine.low %v1387_v57, %v1389_v61 }
  0x6a   : > { %v878_v40 = vor.u32 %v877_v31, %v874_v28  ;;  %v883_v41 = vrot.slane %v881_v32, 5  ;;  %v949_v43 = vsel %vm1755_vm2, %v1405_v19, %v948_v30  ;;  %v1319_v44 = vcombine.low %v1727_v5, %v1739_v13 }
  0x6b   : > { %v865_v33 = vrot.slane %v864_v37, 4  ;;  %v953_v36 = vsel %vm1755_vm2, %v1406_v18, %v952_v27  ;;  %v1320_v20 = vcombine.low %v1797_v42, %v1806_v47  ;;  %v1321_v5 = vcombine.low %v1894_v21, %v1911_v4 }
  0x6c   : > { %705 = vrot.lane.b32.xlu1 %v1374_v16, %s1624_s27  ;;  %v879_v45 = vrot.slane %v878_v40, 4  ;;  %v1410_v0 = vcombine.low %v949_v43, %v953_v36  ;;  %229 = vst.msk [vmem:[#allocation2] sm:$0xff] %vm228_vm6, %v1319_v44  ;;  %v1322_v13 = vcombine.low %v2032_v49, %v2039_v60  ;;  %v977_v60 = vld [vmem:[#allocation2 + $0x18] sm:$0xff]  ;;  %v1411_v16 = vld [vmem:[%s2213_s2] ss:$0 sm:$0xff] }
  0x6d   : > { %v870_v48 = vsel %vm1851_vm5, %v865_v33, %v869_v29  ;;  %762 = vrot.lane.b32.xlu0 %v1394_v38, %s1622_s19  ;;  %230 = vst.msk [vmem:[#allocation2 + $0x10] sm:$0xff] %vm228_vm6, %v1320_v20  ;;  %231 = vst.msk [vmem:[#allocation2 + $0x20] sm:$0xff] %vm228_vm6, %v1321_v5  ;;  %s175_s19 = sand.u32 1, %s1602_s13  }
  0x6e   : > { %v884_v51 = vsel %vm1851_vm5, %v879_v45, %v883_v41  ;;  %973 = vst.msk [vmem:[#allocation2 + $0x38] sm:$0xff] %vm228_vm6, %v1410_v0  ;;  %232 = vst.msk [vmem:[#allocation2 + $0x30] sm:$0xff] %vm228_vm6, %v1322_v13  ;;  %s1317_s21 = sshll.u32 %s175_s19, 4  ;;  %s2163_s6 = scalar_lea.sflag [#allocation4], %s175_s19 }
  0x6f   : > { %v1398_v34 = vcombine.low %v870_v48, %v884_v51  ;;  %s177_s26 = scalar_lea.vmem [#allocation3], %s1317_s21 }
  0x70   : > { %s1230_s27 = sshll.u32 %s177_s26, 4  ;;  %s2155_s27 = int_to_ptr.vmem [resolvable:$true] %s1230_s27 }
  0x71   : > { %903 = vrot.lane.b32.xlu1 %v1398_v34, %s1627_s23  ;;  %s1540_s8 = scalar_lea.vmem %s2155_s27, 256  ;;  %p1547_p1 = scmp.lt.s32.totalorder %s2155_s27, %s1545_s9 }
  0x72   : > { %p1541_p12 = scmp.ne.s32.totalorder %s2155_s27, %s1540_s8  ;;  %p1548_p2 = scmp.lt.s32.totalorder %s1546_s11, %s1540_s8 }
  0x74   : > { %p1542_p13 = pnand %p1541_p12, %p1690_p4  ;;  %p1549_p3 = por %p1548_p2, %p1547_p1 }
  0x75   : > { %v981_v62 = vld [vmem:[#allocation2 + $0x38] sm:$0xff] }
  0x76   : > { %p1543_p0 = pneg %p1542_p13 }
  0x78   : > { %p1550_p5 = pnand %p1549_p3, %p1543_p0 }
  0x90   : > { %v490_v14 = vpop.permute.xlu1 %489 }
  0x94   : > { %v757_v53 = vpop.permute.xlu1 %756 }
  0x97   : > { %v433_v52 = vpop.permute.xlu0 %432 }
  0x9b   : > { %v700_v54 = vpop.permute.xlu0 %699 }
  0x9c   : > { %v435_v42 = vpop.permute.xlu1 %434 }
  0xa3   : > { %v631_v21 = vpop.permute.xlu1 %630 }
  0xa4   : > { %v361_v47 = vpop.permute.xlu0 %360 }
  0xa5   : > { %373 = vst.msk [vmem:[#allocation2] sm:$0xff] %vm372_vm7, %v361_v47 }
  0xa6   : > { %445 = vst.msk [vmem:[#allocation2] sm:$0xff] %vm444_vm8, %v433_v52 }
  0xa7   : > { %502 = vst.msk [vmem:[#allocation2] sm:$0xff] %vm501_vm9, %v490_v14 }
  0xa8   : > { %643 = vst.msk [vmem:[#allocation2] sm:$0xff] %vm642_vm10, %v631_v21  ;;  %v898_v4 = vpop.permute.xlu0 %897 }
  0xa9   : > { %712 = vst.msk [vmem:[#allocation2] sm:$0xff] %vm711_vm11, %v700_v54 }
  0xaa   : > { %769 = vst.msk [vmem:[#allocation2] sm:$0xff] %vm768_vm12, %v757_v53 }
  0xab   : > { %910 = vst.msk [vmem:[#allocation2] sm:$0xff] %vm909_vm13, %v898_v4 }
  0xaf   : > { %v363_v49 = vpop.permute.xlu1 %362 }
  0xb0   : > { %374 = vst.msk [vmem:[#allocation2 + $0x10] sm:$0xff] %vm372_vm7, %v363_v49 }
  0xb1   : > { %446 = vst.msk [vmem:[#allocation2 + $0x10] sm:$0xff] %vm444_vm8, %v435_v42 }
  0xb2   : > { %v974_v55 = vld [vmem:[#allocation2] sm:$0xff] }
  0xb3   : > { %v365_v56 = vpop.permute.xlu0 %364  ;;  %v492_v57 = vpop.permute.xlu1 %491  ;;  %1106 = vmatmul.mubr.bf16.vlgmr.msra.gmra.mrb[0].mxu0 %v974_v55 }
  0xb4   : > { %375 = vst.msk [vmem:[#allocation2 + $0x20] sm:$0xff] %vm372_vm7, %v365_v56  ;;  %1422 = vmatprep.mubr.msk.bf16.mxu0 %vm228_vm6, %v977_v60 }
  0xb5   : > { %503 = vst.msk [vmem:[#allocation2 + $0x10] sm:$0xff] %vm501_vm9, %v492_v57 }
  0xb7   : > { %v437_v58 = vpop.permute.xlu0 %436 }
  0xb8   : > { %447 = vst.msk [vmem:[#allocation2 + $0x20] sm:$0xff] %vm444_vm8, %v437_v58 }
  0xba   : > { %v633_v59 = vpop.permute.xlu1 %632 }
  0xbb   : > { %644 = vst.msk [vmem:[#allocation2 + $0x10] sm:$0xff] %vm642_vm10, %v633_v59  ;;  %v494_v35 = vpop.permute.xlu0 %493 }
  0xbc   : > { %504 = vst.msk [vmem:[#allocation2 + $0x20] sm:$0xff] %vm501_vm9, %v494_v35 }
  0xbe   : > { %v702_v26 = vpop.permute.xlu1 %701 }
  0xbf   : > { %713 = vst.msk [vmem:[#allocation2 + $0x10] sm:$0xff] %vm711_vm11, %v702_v26 }
  0xc0   : > { %v635_v39 = vpop.permute.xlu0 %634 }
  0xc1   : > { %645 = vst.msk [vmem:[#allocation2 + $0x20] sm:$0xff] %vm642_vm10, %v635_v39 }
  0xc2   : > { %v759_v61 = vpop.permute.xlu1 %758 }
  0xc3   : > { %770 = vst.msk [vmem:[#allocation2 + $0x10] sm:$0xff] %vm768_vm12, %v759_v61 }
  0xc4   : > { %v704_v1 = vpop.permute.xlu0 %703 }
  0xc5   : > { %714 = vst.msk [vmem:[#allocation2 + $0x20] sm:$0xff] %vm711_vm11, %v704_v1 }
  0xc8   : > { %v900_v2 = vpop.permute.xlu1 %899  ;;  %v761_v3 = vpop.permute.xlu0 %760 }
  0xc9   : > { %911 = vst.msk [vmem:[#allocation2 + $0x10] sm:$0xff] %vm909_vm13, %v900_v2 }
  0xca   : > { %771 = vst.msk [vmem:[#allocation2 + $0x20] sm:$0xff] %vm768_vm12, %v761_v3 }
  0xcf   : > { %v902_v46 = vpop.permute.xlu0 %901 }
  0xd0   : > { %912 = vst.msk [vmem:[#allocation2 + $0x20] sm:$0xff] %vm909_vm13, %v902_v46  ;;  %v976_v7 = vld [vmem:[#allocation2 + $0x10] sm:$0xff] }
  0xd1   : > { %1114 = vmatmul.mubr.bf16.gmra.mrb[4].mxu0 %v976_v7 }
  0xd3   : > { %v439_v8 = vpop.permute.xlu0 %438 }
  0xd6   : > { %v367_v9 = vpop.permute.xlu1 %366 }
  0xd7   : > { %376 = vst.msk [vmem:[#allocation2 + $0x30] sm:$0xff] %vm372_vm7, %v367_v9  ;;  %v978_v6 = vld [vmem:[#allocation2 + $0x20] sm:$0xff] }
  0xd8   : > { %448 = vst.msk [vmem:[#allocation2 + $0x30] sm:$0xff] %vm444_vm8, %v439_v8  ;;  %1122 = vmatmul.mubr.bf16.vlgmr.msra.gmra.mrb[0].mxu1 %v978_v6 }
  0xd9   : > { %1424 = vmatprep.mubr.msk.bf16.mxu1 %vm228_vm6, %v981_v62  ;;  %vm1210_vm6 = vcmask 519168  }
  0xda   : > { %v496_v10 = vpop.permute.xlu1 %495 }
  0xdb   : > { %505 = vst.msk [vmem:[#allocation2 + $0x30] sm:$0xff] %vm501_vm9, %v496_v10  ;;  %v637_v11 = vpop.permute.xlu0 %636 }
  0xdc   : > { %646 = vst.msk [vmem:[#allocation2 + $0x30] sm:$0xff] %vm642_vm10, %v637_v11 }
  0xde   : > { %v706_v12 = vpop.permute.xlu1 %705 }
  0xdf   : > { %715 = vst.msk [vmem:[#allocation2 + $0x30] sm:$0xff] %vm711_vm11, %v706_v12  ;;  %v763_v50 = vpop.permute.xlu0 %762 }
  0xe0   : > { %772 = vst.msk [vmem:[#allocation2 + $0x30] sm:$0xff] %vm768_vm12, %v763_v50 }
  0xe3   : > { %v904_v63 = vpop.permute.xlu1 %903 }
  0xe4   : > { %913 = vst.msk [vmem:[#allocation2 + $0x30] sm:$0xff] %vm909_vm13, %v904_v63 }
  0xeb   : > { %v980_v15 = vld [vmem:[#allocation2 + $0x30] sm:$0xff] }
  0xec   : > { %1130 = vmatmul.mubr.bf16.gmra.mrb[4].mxu1 %v980_v15 }
 0x186   : > { %v1107_v19 = vpop.f32.mrb[0].mxu0 }
 0x187   : > { %v1108_v18 = vadd.f32 %v1411_v16, %v1107_v19  ;;  %v1109_v17 = vpop.f32.mrb[1].mxu0 }
 0x188   : > { %v1110_v22 = vpop.f32.mrb[2].mxu0 }
 0x189   : > { %v1111_v23 = vadd.f32 %v1411_v16, %v1110_v22  ;;  %v1112_v24 = vpop.f32.mrb[3].mxu0  ;;  %vm1138_vm14 = vcmp.gt.f32.partialorder %v1108_v18, 0.0  ;;  %v1146_v25 = vmul.f32 0.1, %v1108_v18 }
 0x18b   : > { %v1147_v28 = vmul.f32 0.1, %v1111_v23  ;;  %v1154_v31 = vsel %vm1138_vm14, %v1108_v18, %v1146_v25  ;;  %vm1139_vm15 = vcmp.gt.f32.partialorder %v1111_v23, 0.0 }
 0x18c   : > { %1162 = vxpose.xlu0.b32.start [1/8] (short) (narrow) %v1154_v31, 32 }
 0x18d   : > { %v1155_v32 = vsel %vm1139_vm15, %v1111_v23, %v1147_v28 }
 0x190   : > { %1163 = vxpose.xlu0.b32.cont [2/8] (short) (narrow) %v1155_v32, 32 }
 0x1a4   : > { %v1115_v37 = vpop.f32.mrb[4].mxu0 }
 0x1a5   : > { %v1116_v29 = vadd.f32 %v1411_v16, %v1115_v37  ;;  %v1117_v30 = vpop.f32.mrb[5].mxu0 }
 0x1a6   : > { %v1118_v27 = vpop.f32.mrb[6].mxu0 }
 0x1a7   : > { %v1148_v38 = vmul.f32 0.1, %v1116_v29  ;;  %v1119_v40 = vadd.f32 %v1411_v16, %v1118_v27  ;;  %v1120_v41 = vpop.f32.mrb[7].mxu0  ;;  %vm1140_vm0 = vcmp.gt.f32.partialorder %v1116_v29, 0.0 }
 0x1a9   : > { %v1149_v33 = vmul.f32 0.1, %v1119_v40  ;;  %v1156_v43 = vsel %vm1140_vm0, %v1116_v29, %v1148_v38  ;;  %vm1141_vm1 = vcmp.gt.f32.partialorder %v1119_v40, 0.0 }
 0x1aa   : > { %1164 = vxpose.xlu0.b32.cont [3/8] (short) (narrow) %v1156_v43, 32 }
 0x1ab   : > { %v1123_v36 = vpop.f32.mrb[0].mxu1  ;;  %v1157_v48 = vsel %vm1141_vm1, %v1119_v40, %v1149_v33 }
 0x1ac   : > { %v1124_v44 = vadd.f32 %v1411_v16, %v1123_v36  ;;  %v1125_v45 = vpop.f32.mrb[1].mxu1 }
 0x1ad   : > { %v1126_v0 = vpop.f32.mrb[2].mxu1 }
 0x1ae   : > { %v1150_v51 = vmul.f32 0.1, %v1124_v44  ;;  %v1127_v20 = vadd.f32 %v1411_v16, %v1126_v0  ;;  %v1128_v5 = vpop.f32.mrb[3].mxu1  ;;  %1165 = vxpose.xlu0.b32.cont [4/8] (short) (narrow) %v1157_v48, 32  ;;  %vm1142_vm2 = vcmp.gt.f32.partialorder %v1124_v44, 0.0 }
 0x1b0   : > { %v1158_v13 = vsel %vm1142_vm2, %v1124_v44, %v1150_v51  ;;  %v1151_v34 = vmul.f32 0.1, %v1127_v20  ;;  %vm1143_vm3 = vcmp.gt.f32.partialorder %v1127_v20, 0.0 }
 0x1b2   : > { %1166 = vxpose.xlu0.b32.cont [5/8] (short) (narrow) %v1158_v13, 32  ;;  %v1159_v14 = vsel %vm1143_vm3, %v1127_v20, %v1151_v34 }
 0x1b6   : > { %1167 = vxpose.xlu0.b32.cont [6/8] (short) (narrow) %v1159_v14, 32 }
 0x1bf   : > { %v1131_v52 = vpop.f32.mrb[4].mxu1 }
 0x1c0   : > { %v1132_v53 = vadd.f32 %v1411_v16, %v1131_v52  ;;  %v1133_v54 = vpop.f32.mrb[5].mxu1 }
 0x1c1   : > { %v1134_v42 = vpop.f32.mrb[6].mxu1 }
 0x1c2   : > { %v1152_v47 = vmul.f32 0.1, %v1132_v53  ;;  %v1135_v21 = vadd.f32 %v1411_v16, %v1134_v42  ;;  %v1136_v4 = vpop.f32.mrb[7].mxu1  ;;  %vm1144_vm4 = vcmp.gt.f32.partialorder %v1132_v53, 0.0 }
 0x1c4   : > { %v1153_v49 = vmul.f32 0.1, %v1135_v21  ;;  %v1160_v60 = vsel %vm1144_vm4, %v1132_v53, %v1152_v47  ;;  %vm1145_vm5 = vcmp.gt.f32.partialorder %v1135_v21, 0.0 }
 0x1c5   : > { %1168 = vxpose.xlu0.b32.cont [7/8] (short) (narrow) %v1160_v60, 32 }
 0x1c6   : > { %v1161_v55 = vsel %vm1145_vm5, %v1135_v21, %v1153_v49 }
 0x1c9   : > { %1169 = vxpose.xlu0.b32.end [8/8] (short) (narrow) %v1161_v55, 32 }
 0x22d   : > { %v1178_v56 = vpop.trf.xlu0 }
 0x22e   : > { %v1434_v57 = vpack.c.bf16 %v1178_v56, %v1178_v56 }
 0x230   : > { %1211 = vst.msk [vmem:[%s177_s26] sm:$0xf] %vm1210_vm6, %v1434_v57 }
 0x231   : > { %v1179_v58 = vpop.trf.xlu0 }
 0x232   : > { %v1435_v59 = vpack.c.bf16 %v1179_v58, %v1179_v58 }
 0x234   : > { %1212 = vst.msk [vmem:[%s177_s26 + $0x4] sm:$0xf] %vm1210_vm6, %v1435_v59 }
 0x235   : > { %v1180_v35 = vpop.trf.xlu0 }
 0x236   : > { %v1436_v26 = vpack.c.bf16 %v1180_v35, %v1180_v35 }
 0x238   : > { %1213 = vst.msk [vmem:[%s177_s26 + $0x8] sm:$0xf] %vm1210_vm6, %v1436_v26 }
 0x239   : > { %v1181_v39 = vpop.trf.xlu0 }
 0x23a   : > { %v1437_v61 = vpack.c.bf16 %v1181_v39, %v1181_v39 }
 0x23c   : > { %1214 = vst.msk [vmem:[%s177_s26 + $0xc] sm:$0xf] %vm1210_vm6, %v1437_v61 }
 0x23d   : > { %1553 = shalt.err (!%p1550_p5)
}
 0x23e   : > { %s1554_s18 = scalar_lea.hbm %s2160_s4, 256  ;;  %s1558_s10 = scalar_lea.hbm %s2214_s3, 512 }
 0x23f   : > { %p1555_p6 = scmp.ne.s32.totalorder %s2160_s4, %s1554_s18  ;;  %p1559_p10 = scmp.lt.u32.totalorder %s2160_s4, %s2214_s3 }
 0x240   : > { %p1560_p11 = scmp.lt.u32.totalorder %s1558_s10, %s1554_s18  ;;  %p1562_p13 = scmp.lt.u32.totalorder %s1554_s18, %s2160_s4 }
 0x241   : > { %p1556_p7 = pnand %p1555_p6, %p1690_p4 }
 0x242   : > { %p1561_p12 = por %p1560_p11, %p1559_p10 }
 0x243   : > { %p1557_p9 = pneg %p1556_p7 }
 0x244   : > { %p1563_p0 = por %p1562_p13, %p1561_p12 }
 0x246   : > { %p1564_p1 = pnand %p1563_p0, %p1557_p9 }
 0x248   : > { %1567 = shalt.err (!%p1564_p1)
}
 0x249   : > { %s1629_s26 = smov 4  }
 0x24a   : > { %1458 = dma.vmem_to_hbm [thread:$0]  (%p1690_p4), %s2155_s27, 256, %s2160_s4, %s2163_s6, %s1625_s5, %s1625_s5, %s1629_s26  }
 0x24b PF: > { %p1464_p2 = scmp.ge.s32.totalorder %s1618_s17, 2  ;;  %s1245_s28 = sand.u32 1, %s1598_s12  }
 0x24c   : > { %s1246_s29 = scalar_lea.sflag [#allocation4], %s1245_s28 }
 0x24d   : > { %p1461_p3 = pnand %p1464_p2, %p1697_p8 }
 0x24f   : > { %1593 = dma.done.wait (!%p1461_p3), %s1246_s29, 256  }
 0x250   : > { %1595 = vsyncadd (!%p1461_p3), %s1246_s29, 4294967040  ;;  %s16_s17 = sadd.s32 1, %s1618_s17   ;;  %s2221_s12 = smov %s1602_s13 }
 0x251   : > { %p13_p5 = scmp.ge.s32.totalorder %s16_s17, 4   ;;  %s2222_s13 = smov %s1606_s14 }
 0x252   : > { %s2223_s14 = smov %s1703_s25  ;;  %s2224_s15 = smov %s1614_s16 }
 0x253   : > { %s2225_s16 = smov %s2227_s20  ;;  %15 = sbr.rel (!%p13_p5) target bundleno = 4 (0x4), region = 70 }
 0x25a   :  { %1251 = vsyncpa [#allocation4], 1 }
 0x25b   :  { %1253 = vsyncpa [#allocation4 + $0x1], 1 }

</bundles_post_ra>
